<compile_context>
chip_gen: v7x
topology: tpu7x:2x2x1
jax: 0.10.0
libtpu: 0.0.40
codegen_flags: <defaults>
</compile_context>

<pallas_src>
import jax
import jax.numpy as jnp
from jax.experimental import pallas as pl
from jax.experimental.pallas import tpu as pltpu


# ---------------------------------------------------------------------------
# Budgets (generation-agnostic: safe on v5e/v6e 128 MiB and v7x 64 MiB VMEM).
# ---------------------------------------------------------------------------
_VMEM_LIMIT_BYTES = 48 * 1024 * 1024          # explicit scoped-VMEM limit
_TWO_PASS_TILE_BYTES = 6 * 1024 * 1024        # per input tile (pass2 dbl-bufs 4x)
_FUSED_SLAB_LIMIT_BYTES = 6 * 1024 * 1024     # per-channel slab (dbl-buf in+out 4x)


def _round_up(x, m):
    return ((x + m - 1) // m) * m


def _sublane_align(itemsize):
    # Sub-32-bit dtypes pack rows along sublanes.
    return {4: 8, 2: 16, 1: 32}.get(itemsize, 8)


def _pick_row_tile(R, align, target=512):
    """Row tile: multiple of `align`, <= target, divides the aligned row count,
    and (when possible) leaves >= 2 row blocks so the 'parallel' row axis can
    be sharded across TensorCores (v7x megacore)."""
    r_al = _round_up(R, align)
    cap = r_al
    if r_al >= 2 * align:
        cap = max(align, ((r_al // 2) // align) * align)
    hi = min(max(align, (target // align) * align), cap)
    for cand in range(hi, align - 1, -align):
        if r_al % cand == 0:
            return cand
    return align


def _pick_col_tile(M, itemsize, tr, target_bytes=_TWO_PASS_TILE_BYTES):
    """Column tile: multiple of 128 sized so tr*tm*itemsize ~= target_bytes."""
    m_al = _round_up(M, 128)
    tm = max(128, (target_bytes // (tr * itemsize)) // 128 * 128)
    if tm >= m_al:
        return m_al
    # Prefer a divisor of the 128-aligned width (no column padding) as long as
    # the tile stays within 2x of the byte target; otherwise pad M up to a
    # multiple of tm (at most one extra tile's worth of zeros).
    for cand in range(tm, tm // 2 - 1, -128):
        if m_al % cand == 0:
            return cand
    return tm


# ---------------------------------------------------------------------------
# Kernels
# ---------------------------------------------------------------------------
def _make_fused_kernel(inv_count):
    """Fused single-read kernel: one grid step == one channel slab."""

    def kernel(x_ref, bias_ref, o_ref, mean_ref):
        # x_ref / o_ref : (N, 1, D, H*W) VMEM slab for channel c
        # bias_ref      : (C,) f32 in SMEM
        # mean_ref      : (C,) f32 in SMEM (per-channel batch mean output)
        c = pl.program_id(0)
        mean = jnp.sum(x_ref[...].astype(jnp.float32)) * inv_count
        mean_ref[c] = mean
        o_ref[...] = (
            x_ref[...].astype(jnp.float32) + (bias_ref[c] - mean)
        ).astype(o_ref.dtype)

    return kernel


def _row_sum_kernel(x_ref, sum_ref):
    # x_ref:   (TR, TM) tile of the (R_pad, M_pad) view
    # sum_ref: (TR, 1)  per-row sum, resident across the reduction (last) axis
    @pl.when(pl.program_id(1) == 0)
    def _():
        sum_ref[...] = jnp.zeros_like(sum_ref)

    sum_ref[...] += jnp.sum(x_ref[...].astype(jnp.float32), axis=1, keepdims=True)


def _apply_kernel(x_ref, shift_ref, o_ref):
    # x_ref: (TR, TM), shift_ref: (TR, 1) holding (bias - mean) per row.
    o_ref[...] = (x_ref[...].astype(jnp.float32) + shift_ref[...]).astype(o_ref.dtype)


# ---------------------------------------------------------------------------
# Wrappers
# ---------------------------------------------------------------------------
def _fused_call(x, bias32, N, C, D, HW, M, itemsize):
    """Read-once / write-once path: grid over channels."""
    x4 = x.reshape(N, C, D, HW)                      # contiguous (free) reshape
    blk = (N, 1, D, HW)                              # last two dims == full dims
    kernel = _make_fused_kernel(1.0 / float(N * M))
    y4, channel_mean = pl.pallas_call(
        kernel,
        out_shape=(
            jax.ShapeDtypeStruct((N, C, D, HW), x.dtype),
            jax.ShapeDtypeStruct((C,), jnp.float32),
        ),
        grid=(C,),
        in_specs=[
            pl.BlockSpec(blk, lambda c: (0, c, 0, 0)),
            pl.BlockSpec(memory_space=pltpu.MemorySpace.SMEM),
        ],
        out_specs=(
            pl.BlockSpec(blk, lambda c: (0, c, 0, 0)),
            pl.BlockSpec(memory_space=pltpu.MemorySpace.SMEM),
        ),
        input_output_aliases={0: 0},                 # y reuses x's HBM buffer if donated
        compiler_params=pltpu.CompilerParams(
            dimension_semantics=("parallel",),       # channels shard across cores (v7x)
            vmem_limit_bytes=_VMEM_LIMIT_BYTES,
        ),
        cost_estimate=pl.CostEstimate(
            flops=2 * N * C * M,
            transcendentals=0,
            bytes_accessed=2 * N * C * M * itemsize + C * 8,
        ),
    )(x4, bias32)
    return y4, channel_mean


def _two_pass_call(x, bias32, N, C, M, itemsize, row_align):
    """Fallback for large channel slabs: tiled row-sum pass + tiled apply pass."""
    R = N * C
    TR = _pick_row_tile(R, row_align)
    TM = _pick_col_tile(M, itemsize, TR)
    R_pad = _round_up(R, TR)
    M_pad = _round_up(M, TM)

    x2 = x.reshape(R, M)                             # contiguous (free) reshape
    if R_pad != R or M_pad != M:
        # Zero padding is exact for the sums and the padded region is sliced off.
        x2 = jnp.pad(x2, ((0, R_pad - R), (0, M_pad - M)))

    # ---- Pass 1: per-row sums (reduction axis last + "arbitrary") ----
    row_sums = pl.pallas_call(
        _row_sum_kernel,
        out_shape=jax.ShapeDtypeStruct((R_pad, 1), jnp.float32),
        grid=(R_pad // TR, M_pad // TM),
        in_specs=[pl.BlockSpec((TR, TM), lambda r, m: (r, m))],
        out_specs=pl.BlockSpec((TR, 1), lambda r, m: (r, 0)),
        compiler_params=pltpu.CompilerParams(
            dimension_semantics=("parallel", "arbitrary"),
            vmem_limit_bytes=_VMEM_LIMIT_BYTES,
        ),
        cost_estimate=pl.CostEstimate(
            flops=R_pad * M_pad,
            transcendentals=0,
            bytes_accessed=R_pad * M_pad * itemsize + R_pad * 4,
        ),
    )(x2)

    # Tiny per-channel finalize (C values).
    channel_mean = row_sums[:R, 0].reshape(N, C).sum(axis=0) / float(N * M)

    # Per-row shift = bias[c] - mean[c]; rows are n-major, c-minor.
    shift = jnp.tile(bias32 - channel_mean, (N,)).reshape(R, 1)
    if R_pad != R:
        shift = jnp.pad(shift, ((0, R_pad - R), (0, 0)))

    # ---- Pass 2: x + (bias - mean), lane-dense tiles, both axes parallel ----
    y2 = pl.pallas_call(
        _apply_kernel,
        out_shape=jax.ShapeDtypeStruct((R_pad, M_pad), x.dtype),
        grid=(R_pad // TR, M_pad // TM),
        in_specs=[
            pl.BlockSpec((TR, TM), lambda r, m: (r, m)),
            pl.BlockSpec((TR, 1), lambda r, m: (r, 0)),
        ],
        out_specs=pl.BlockSpec((TR, TM), lambda r, m: (r, m)),
        input_output_aliases={0: 0},
        compiler_params=pltpu.CompilerParams(
            dimension_semantics=("parallel", "parallel"),
            vmem_limit_bytes=_VMEM_LIMIT_BYTES,
        ),
        cost_estimate=pl.CostEstimate(
            flops=R_pad * M_pad,
            transcendentals=0,
            bytes_accessed=2 * R_pad * M_pad * itemsize,
        ),
    )(x2, shift)

    if R_pad != R or M_pad != M:
        y2 = y2[:R, :M]
    return y2, channel_mean


def mean_only_batchnorm_3d(x, bias, running_mean, momentum=0.1, *,
                           force_two_pass=False):
    """x: (N, C, D, H, W); bias/running_mean: (C,).

    Returns (output, new_running_mean), matching the PyTorch module's
    training-mode forward. For best performance callers should donate `x`
    at the jit boundary so the output aliases x's HBM buffer.
    """
    # TODO(synk): eval-mode branch (use running_mean instead of the batch mean)
    # is not implemented; the module defaults to training mode after __init__.
    N, C, D, H, W = x.shape
    HW = H * W
    M = D * HW
    itemsize = jnp.dtype(x.dtype).itemsize
    bias32 = bias.astype(jnp.float32)

    row_align = _sublane_align(itemsize)
    # VMEM-padded size of one channel slab (what the fused path keeps resident).
    padded_slab = N * _round_up(D, row_align) * _round_up(HW, 128) * itemsize
    use_fused = (not force_two_pass) and padded_slab <= _FUSED_SLAB_LIMIT_BYTES

    if use_fused:
        y, channel_mean = _fused_call(x, bias32, N, C, D, HW, M, itemsize)
    else:
        y, channel_mean = _two_pass_call(x, bias32, N, C, M, itemsize, row_align)

    out = y.reshape(N, C, D, H, W)                   # contiguous (free) reshape back
    new_running_mean = (
        (1.0 - momentum) * running_mean
        + momentum * channel_mean.astype(running_mean.dtype)
    )
    return out, new_running_mean


if __name__ == "__main__":
    key = jax.random.PRNGKey(0)
    N, C, D, H, W = 2, 4, 4, 8, 8

    x = jax.random.normal(key, (N, C, D, H, W), dtype=jnp.float32)
    # nn.Parameter(torch.zeros(C)) plus a deterministic nonzero perturbation so
    # the bias path is actually exercised.
    bias = jnp.arange(C, dtype=jnp.float32) * 0.1
    running_mean = jnp.zeros((C,), dtype=jnp.float32)
    momentum = 0.1

    # Pure-JAX reference.
    avg_ref = jnp.mean(x, axis=(0, 2, 3, 4))
    out_ref = x - avg_ref.reshape(1, C, 1, 1, 1) + bias.reshape(1, C, 1, 1, 1)
    rm_ref = (1.0 - momentum) * running_mean + momentum * avg_ref

    fn = jax.jit(mean_only_batchnorm_3d, static_argnames=("force_two_pass",))

    # Fused single-read path (default at this size).
    out_f, rm_f = fn(x, bias, running_mean, momentum)
    out_f, rm_f = jax.block_until_ready((out_f, rm_f))

    # Tiled two-pass fallback path, exercised explicitly for coverage.
    out_t, rm_t = fn(x, bias, running_mean, momentum, force_two_pass=True)
    out_t, rm_t = jax.block_until_ready((out_t, rm_t))

    assert out_f.shape == (N, C, D, H, W)
    assert jnp.allclose(out_f, out_ref, atol=1e-5, rtol=1e-5)
    assert jnp.allclose(rm_f, rm_ref, atol=1e-6, rtol=1e-6)
    assert jnp.allclose(out_t, out_ref, atol=1e-5, rtol=1e-5)
    assert jnp.allclose(rm_t, rm_ref, atol=1e-6, rtol=1e-6)

    print("KERNEL_OK")
</pallas_src>

<mosaic_0001>
module attributes {stable_mosaic.version = 11 : i64} {
  func.func @kernel(%arg0: i32, %arg1: memref<2x1x4x64xf32, #tpu.memory_space<vmem>>, %arg2: memref<4xf32, #tpu.memory_space<smem>>, %arg3: memref<2x1x4x64xf32, #tpu.memory_space<vmem>>, %arg4: memref<4xf32, #tpu.memory_space<smem>>) attributes {dimension_semantics = [#tpu.dimension_semantics<parallel>], iteration_bounds = array<i64: 4>, scalar_prefetch = 0 : i64, scratch_operands = 0 : i64, tpu.core_type = #tpu.core_type<tc>, window_params = [{transform_indices = @transform_0, window_bounds = array<i64: 2, 1, 4, 64>}, {transform_indices = @transform_1, window_bounds = array<i64: 4>}, {transform_indices = @transform_2, window_bounds = array<i64: 2, 1, 4, 64>}, {transform_indices = @transform_3, window_bounds = array<i64: 4>}]} {
    %c0 = arith.constant 0 : index
    %c0_0 = arith.constant 0 : index
    %c0_1 = arith.constant 0 : index
    %c0_2 = arith.constant 0 : index
    %0 = vector.load %arg1[%c0, %c0_0, %c0_1, %c0_2] : memref<2x1x4x64xf32, #tpu.memory_space<vmem>>, vector<2x1x4x64xf32>
    %1 = vector.shape_cast %0 : vector<2x1x4x64xf32> to vector<1x2x1x4x64xf32>
    %cst = arith.constant dense<0.000000e+00> : vector<1xf32>
    %2 = vector.multi_reduction <add>, %1, %cst [1, 2, 3, 4] : vector<1x2x1x4x64xf32> to vector<1xf32>
    %3 = vector.shape_cast %2 : vector<1xf32> to vector<1x1x1x1x1xf32>
    %4 = vector.extract %3[0, 0, 0, 0, 0] : f32 from vector<1x1x1x1x1xf32>
    %cst_3 = arith.constant 0.001953125 : f32
    %5 = arith.mulf %4, %cst_3 : f32
    %6 = arith.index_cast %arg0 : i32 to index
    %7 = memref.load %arg4[%6] : memref<4xf32, #tpu.memory_space<smem>>
    memref.store %5, %arg4[%6] : memref<4xf32, #tpu.memory_space<smem>>
    %c0_4 = arith.constant 0 : index
    %c0_5 = arith.constant 0 : index
    %c0_6 = arith.constant 0 : index
    %c0_7 = arith.constant 0 : index
    %8 = vector.load %arg1[%c0_4, %c0_5, %c0_6, %c0_7] : memref<2x1x4x64xf32, #tpu.memory_space<vmem>>, vector<2x1x4x64xf32>
    %9 = arith.index_cast %arg0 : i32 to index
    %10 = memref.load %arg2[%9] : memref<4xf32, #tpu.memory_space<smem>>
    %11 = arith.subf %10, %5 : f32
    %12 = vector.broadcast %11 : f32 to vector<2x1x4x64xf32>
    %13 = arith.addf %8, %12 : vector<2x1x4x64xf32>
    %c0_8 = arith.constant 0 : index
    %c0_9 = arith.constant 0 : index
    %c0_10 = arith.constant 0 : index
    %c0_11 = arith.constant 0 : index
    %14 = vector.load %arg3[%c0_8, %c0_9, %c0_10, %c0_11] : memref<2x1x4x64xf32, #tpu.memory_space<vmem>>, vector<2x1x4x64xf32>
    tpu.vector_store %arg3[%c0_8, %c0_9, %c0_10, %c0_11], %13 {strides = array<i32>} : memref<2x1x4x64xf32, #tpu.memory_space<vmem>>, vector<2x1x4x64xf32>,
    return
  }
  func.func @transform_0(%arg0: i32) -> (i32, i32, i32, i32) {
    %c0_i32 = arith.constant 0 : i32
    %c0_i32_0 = arith.constant 0 : i32
    %c0_i32_1 = arith.constant 0 : i32
    %c0_i32_2 = arith.constant 0 : i32
    return %c0_i32, %arg0, %c0_i32_0, %c0_i32_1 : i32, i32, i32, i32
  }
  func.func @transform_1(%arg0: i32) -> i32 {
    %c0_i32 = arith.constant 0 : i32
    %c0_i32_0 = arith.constant 0 : i32
    return %c0_i32 : i32
  }
  func.func @transform_2(%arg0: i32) -> (i32, i32, i32, i32) {
    %c0_i32 = arith.constant 0 : i32
    %c0_i32_0 = arith.constant 0 : i32
    %c0_i32_1 = arith.constant 0 : i32
    %c0_i32_2 = arith.constant 0 : i32
    return %c0_i32, %arg0, %c0_i32_0, %c0_i32_1 : i32, i32, i32, i32
  }
  func.func @transform_3(%arg0: i32) -> i32 {
    %c0_i32 = arith.constant 0 : i32
    %c0_i32_0 = arith.constant 0 : i32
    return %c0_i32 : i32
  }
}

</mosaic_0001>

<bundles_post_ra>
// kernel: mean_only_batchnorm_3d.1
= control target key start
LH: loop header
LB: loop body
LE: loop exit
PB: predicated region body
PF: predicated region fallthrough
CT: control target
= control target key end

     0   :  { %9 = vsyncpa [#allocation4], 0  ;;  %s650_s0 = inlined_call_operand.vmem [shape: f32[2,4,4,64], index: 0, kind: input, shape index: {}, may-alias: {0,2}]   ;;  %s651_s1 = inlined_call_operand.vmem [shape: f32[4], index: 1, kind: input, shape index: {}]   ;;  %s652_s2 = inlined_call_operand.vmem [shape: f32[2,4,4,64], index: 2, kind: output, shape index: {0}, may-alias: {0,2}]   ;;  %s653_s3 = inlined_call_operand.vmem [shape: f32[4], index: 3, kind: output, shape index: {1}]  }
   0x1   :  { %10 = vsyncpa [#allocation5], 0  ;;  %s543_s12 = smov 0   ;;  %s545_s13 = smov 0  }
   0x2   :  { %s547_s14 = smov 0  }
   0x3 LB: > { %s559_s15 = sadd.s32 4294967295, %s519_s14   ;;  %s562_s16 = sadd.s32 1, %s519_s14   ;;  %s519_s14 = sphi %s547_s14, %s665_s14   ;;  %s515_s13 = sphi %s545_s13, %s664_s13   ;;  %s511_s12 = sphi %s543_s12, %s663_s12  }
   0x4   : > { %s20_s17 = ssub.s32 %s519_s14, %s562_s16  ;;  %s23_s18 = sadd.s32 1, %s515_s13 }
   0x5   : > { %p21_p0 = scmp.eq.s32.totalorder %s20_s17, 0  ;;  %p30_p1 = scmp.ne.s32.totalorder %s515_s13, %s511_s12 }
   0x6   : > { %p31_p2 = scmp.eq.s32.totalorder %s519_s14, 0  ;;  %p654_p3 = scmp.eq.s32.totalorder %s559_s15, 3 }
   0x7   : > { %s572_s19 = scalar_select %p21_p0, %s515_s13, %s23_s18  }
   0x8   : > { %p574_p4 = por %p31_p2, %p30_p1  ;;  %p580_p5 = por %p654_p3, %p30_p1 }
   0x9   : > { %p398_p6 = scmp.ge.s32.totalorder %s519_s14, 1  ;;  %p115_p7 = scmp.lt.s32.totalorder %s519_s14, 5 }
   0xa   : > { %s656_s21 = scalar_select %p580_p5, 1, 0 }
   0xb   : > { %p430_p8 = scmp.eq.s32.totalorder %s559_s15, 0  ;;  %p587_p9 = pnand %p398_p6, %p115_p7 }
   0xc   : > { %s128_s25 = sshll.u32 %s651_s1, 4  ;;  %s129_s25 = int_to_ptr.vmem [resolvable:$true] %s128_s25 }
   0xd   : > { %p426_p10 = pneg %p587_p9  ;;  %s460_s26 = scalar_lea.vmem %s129_s25, 16 }
   0xe   : > { %p461_p12 = scmp.ne.s32.totalorder %s129_s25, %s460_s26  ;;  %p468_p2 = scmp.lt.s32.totalorder %s129_s25, %s129_s25 }
   0xf   : > { %p427_p11 = pnand %p430_p8, %p426_p10  ;;  %p469_p6 = scmp.lt.s32.totalorder %s460_s26, %s460_s26 }
  0x11   : > { %p462_p13 = pneg %p427_p11  ;;  %p470_p7 = por %p469_p6, %p468_p2 }
  0x13   : > { %p463_p0 = pnand %p462_p13, %p461_p12 }
  0x15   : > { %p464_p1 = pneg %p463_p0 }
  0x17   : > { %p471_p3 = pnand %p470_p7, %p464_p1 }
  0x19   : > { %474 = shalt.err (!%p471_p3)
}
  0x1a   : > { %s521_s27 = smov [#allocation3]   ;;  %p400_p5 = scmp.ge.s32.totalorder %s519_s14, 4 }
  0x1b   : > { %429 = dma.vmem_to_smem (!%p427_p11), %s129_s25, 16, %s521_s27, [#allocation4]  }
  0x1c   : > { %135 = sbr.rel (%p400_p5) target bundleno = 42 (0x2a), region = 20 }
  0x23   : > { %138 = sbr.rel (!%p574_p4) target bundleno = 42 (0x2a), region = 24  ;;  %s140_s28 = sand.u32 (%p574_p4), 1, %s515_s13  }
  0x24   : > { %s402_s29 = sshll.u32 (%p574_p4), %s519_s14, 2  ;;  %s401_s30 = sshll.u32 (%p574_p4), %s140_s28, 3 }
  0x25   : > { %s144_s6 = scalar_lea.vmem (%p574_p4), %s650_s0, %s402_s29  ;;  %s142_s7 = scalar_lea.vmem (%p574_p4), [#allocation2], %s401_s30 }
  0x26   : > { %v160_v0 = vld [vmem:[%s144_s6] sm:$0xf] (%p574_p4)  ;;  %v162_v1 = vld [vmem:[%s144_s6 + $0x10] sm:$0xf] (%p574_p4) }
  0x27   : > { %161 = vst [vmem:[%s142_s7] sm:$0xf] (%p574_p4), %v160_v0  ;;  %163 = vst [vmem:[%s142_s7 + $0x4] sm:$0xf] (%p574_p4), %v162_v1 }
  0x2a PF: > { %193 = sbr.rel (%p587_p9) target bundleno = 296 (0x128), region = 65  ;;  %s196_s8 = sand.u32 (!%p587_p9), 1, %s511_s12  }
  0x2b   : > { %s609_s9 = sshll.u32 (!%p587_p9), %s196_s8, 3 }
  0x2c   : > { %s198_s10 = scalar_lea.vmem (!%p587_p9), [#allocation2], %s609_s9 }
  0x31   : > { %502 = dma.done.wait (%p430_p8), [#allocation4], 16  }
  0x32   : > { %504 = vsyncadd (%p430_p8), [#allocation4], 4294967280 }
  0x33   : > { %206 = sfence }
  0x34   : > { %v223_v2 = vld [vmem:[%s198_s10] sm:$0xf]  ;;  %v224_v3 = vld [vmem:[%s198_s10 + $0x4] sm:$0xf]  ;;  %vm225_vm0 = vcmask 519168   ;;  %s243_s11 = sld [smem:[#allocation3 + %s559_s15]] }
  0x35   : > { %v226_v4 = vsel %vm225_vm0, %v223_v2, 0.0  ;;  %v227_v5 = vsel %vm225_vm0, %v224_v3, 0.0  ;;  %s414_s17 = scalar_lea.smem [#allocation7], %s519_s14  ;;  %v241_v14 = vld [vmem:[%s198_s10] sm:$0xf]  ;;  %s220_s23 = scalar_lea.vmem [#allocation6], %s609_s9 }
  0x36   : > { %v228_v6 = vadd.f32 %v227_v5, %v226_v4  ;;  %s415_s18 = scalar_lea.smem %s414_s17, 4294967295 [#allocation7]  ;;  %v242_v15 = vld [vmem:[%s198_s10 + $0x4] sm:$0xf]  ;;  %p658_p3 = scmp.ne.s32.totalorder %s656_s21, 0 }
  0x37   : > { %s409_s24 = sshll.u32 (%p658_p3), %s559_s15, 2 }
  0x38   : > { %229 = vadd.xlane.f32.xlu0 %v228_v6  ;;  %s258_s26 = scalar_lea.vmem (%p658_p3), %s652_s2, %s409_s24 }
  0xc5   : > { %v230_v7 = vpop.xlane.xlu0 %229 }
  0xc6   : > { %v231_v8 = vrot.slane %v230_v7, 4 }
  0xc8   : > { %v232_v9 = vadd.f32 %v231_v8, %v230_v7 }
  0xca   : > { %v233_v10 = vrot.slane %v232_v9, 2 }
  0xcc   : > { %v234_v11 = vadd.f32 %v233_v10, %v232_v9 }
  0xce   : > { %v235_v12 = vrot.slane %v234_v11, 1 }
  0xd0   : > { %v236_v13 = vadd.f32 %v235_v12, %v234_v11 }
  0xd2   : > { %416 = vpush %v236_v13 }
 0x103   : > { %s417_s12 = spop %416 }
 0x104   : > { %s238_s20 = smul.f32 0.001953125, %s417_s12 }
 0x106   : > { %240 = sst [smem:[%s415_s18]] %s238_s20  ;;  %256 = sbr.rel (!%p658_p3) target bundleno = 277 (0x115), region = 77 }
 0x107   : > { %s244_s22 = ssub.f32 %s243_s11, %s238_s20 }
 0x109   : > { %v245_v16 = vstv %s244_s22 }
 0x10a   : > { %v246_v17 = vadd.f32 %v245_v16, %v241_v14  ;;  %v247_v18 = vadd.f32 %v245_v16, %v242_v15 }
 0x10c   : > { %248 = vst.msk [vmem:[%s220_s23] sm:$0xf] %vm225_vm0, %v246_v17  ;;  %249 = vst.msk [vmem:[%s220_s23 + $0x4] sm:$0xf] %vm225_vm0, %v247_v18 }
 0x113   : > { %v274_v19 = vld [vmem:[%s220_s23] sm:$0xf]  ;;  %v276_v20 = vld [vmem:[%s220_s23 + $0x4] sm:$0xf] }
 0x114   : > { %275 = vst [vmem:[%s258_s26] sm:$0xf] %v274_v19  ;;  %277 = vst [vmem:[%s258_s26 + $0x10] sm:$0xf] %v276_v20 }
 0x115 PF: > { %s309_s29 = sshll.u32 %s653_s3, 4  ;;  %p659_p5 = scmp.eq.s32.totalorder %s559_s15, 3  ;;  %s310_s29 = int_to_ptr.vmem [resolvable:$true] %s309_s29 }
 0x116   : > { %s475_s30 = scalar_lea.vmem %s310_s29, 16  ;;  %p482_p10 = scmp.lt.s32.totalorder %s310_s29, %s310_s29 }
 0x117   : > { %p476_p4 = scmp.ne.s32.totalorder %s310_s29, %s475_s30  ;;  %p483_p11 = scmp.lt.s32.totalorder %s475_s30, %s475_s30 }
 0x119   : > { %p477_p8 = pnand %p476_p4, %p659_p5  ;;  %p484_p12 = por %p483_p11, %p482_p10 }
 0x11b   : > { %p478_p9 = pneg %p477_p8 }
 0x11d   : > { %p485_p13 = pnand %p484_p12, %p478_p9 }
 0x11f   : > { %488 = shalt.err (!%p485_p13)
}
 0x120   : > { %s522_s21 = smov [#allocation7]   ;;  %p660_p0 = pmov %p659_p5 }
 0x122   : > { %423 = dma.smem_to_vmem (%p660_p0), %s522_s21, 16, %s310_s29, [#allocation5]  }
 0x123   : > { %p661_p1 = pmov %p660_p0 }
 0x124   : > { %p662_p2 = pmov %p660_p0 }
 0x125   : > { %506 = dma.done.wait (%p661_p1), [#allocation5], 16  }
 0x126   : > { %508 = vsyncadd (%p662_p2), [#allocation5], 4294967280 }
 0x127   : > { %317 = sfence }
 0x128 PF: > { %p13_p6 = scmp.ge.s32.totalorder %s562_s16, 6   ;;  %s663_s12 = smov %s515_s13 }
 0x129   : > { %s664_s13 = smov %s572_s19  ;;  %s665_s14 = smov %s562_s16 }
 0x12a   :  { %15 = sbr.rel (!%p13_p6) target bundleno = 3 (0x3), region = 160 }
 0x131   :  { %330 = vsyncpa [#allocation4], 1 }
 0x132   :  { %332 = vsyncpa [#allocation4 + $0x1], 1 }
 0x133   :  { %333 = vsyncpa [#allocation5], 1 }
 0x134   :  { %335 = vsyncpa [#allocation5 + $0x1], 1 }

</bundles_post_ra>
